<compile_context>
chip_gen: v7x
topology: tpu7x:2x2x1
jax: 0.10.0
libtpu: 0.0.40
codegen_flags: <defaults>
</compile_context>

<pallas_src>
import math

import jax
import jax.numpy as jnp
from jax.experimental import pallas as pl
from jax.experimental.pallas import tpu as pltpu


def _round_up(n, m):
    return ((n + m - 1) // m) * m


def _pad_to(a, shape):
    """Zero-pad `a` up to `shape` (no-op copy avoided when already aligned)."""
    if tuple(a.shape) == tuple(shape):
        return a
    return jnp.zeros(shape, a.dtype).at[tuple(slice(0, s) for s in a.shape)].set(a)


def _pick_tile_b(batch, cap=1024):
    """Pick the batch tile: largest tile wins unless zero-padding waste
    outweighs the saved per-grid-step overhead (~600 cycles/step)."""
    b8 = _round_up(batch, 8)
    if b8 <= cap:
        return b8                      # single grid step, no waste
    step_cost = 600.0                  # ~cycles of fixed per-step overhead
    row_cost = 2.0                     # ~cycles per (possibly padded) batch row
    best_t, best_c = 8, float("inf")
    for t in (1024, 768, 512, 384, 256, 128, 64, 32, 16, 8):
        if t > cap:
            continue
        b_pad = _round_up(batch, t)
        c = (b_pad // t) * step_cost + b_pad * row_cost
        if c < best_c:
            best_c, best_t = c, t
    return best_t


def _mlp_kernel(x_ref, w1_ref, b1_ref, w2_ref, b2_ref, o_ref):
    # Hot path: two MXU matmuls (f32 accumulation) + VPU bias add / ReLU,
    # fully fused in VMEM for this batch tile.
    x = x_ref[...]
    h = jnp.dot(x, w1_ref[...], preferred_element_type=jnp.float32) + b1_ref[...]
    h = jnp.maximum(h, 0.0)                           # ReLU (f32 epilogue, v5e-safe)
    out = jnp.dot(h, w2_ref[...], preferred_element_type=jnp.float32) + b2_ref[...]
    o_ref[...] = out.astype(o_ref.dtype)


def network_forward(x, w1, b1, w2, b2, *, block_b=1024):
    """Pallas equivalent of Network.forward.

    x:  (B, state_n) float32
    w1: (state_n, 256), b1: (1, 256)
    w2: (256, action_n), b2: (1, action_n)
    returns (B, action_n) float32
    """
    B, state_n = x.shape
    hidden = w1.shape[1]
    action_n = w2.shape[1]

    # Lane/sublane friendly padded sizes.
    k_pad = _round_up(state_n, 128)          # contraction dim -> full lanes
    n_pad = _round_up(action_n, 128)         # output dim -> unmasked vst
    tile_b = _pick_tile_b(B, cap=block_b)    # batch tile, multiple of 8 (f32 sublane)
    b_pad = _round_up(B, tile_b)

    # One-time zero padding outside the kernel (skipped when already aligned;
    # fuses under jit at the call site). Padded K rows/cols and padded N cols
    # are zeros -> no effect on real outputs.
    xp = _pad_to(x, (b_pad, k_pad))
    w1p = _pad_to(w1, (k_pad, hidden))
    w2p = _pad_to(w2, (hidden, n_pad))
    b2p = _pad_to(b2, (1, n_pad))

    grid = (b_pad // tile_b,)

    out = pl.pallas_call(
        _mlp_kernel,
        out_shape=jax.ShapeDtypeStruct((b_pad, n_pad), jnp.float32),
        grid=grid,
        in_specs=[
            # x: streamed per batch tile (double-buffered by the BlockSpec pipeline)
            pl.BlockSpec((tile_b, k_pad), lambda i: (i, 0)),
            # weights / biases: resident in VMEM across all grid steps
            pl.BlockSpec((k_pad, hidden), lambda i: (0, 0)),
            pl.BlockSpec((1, hidden), lambda i: (0, 0)),
            pl.BlockSpec((hidden, n_pad), lambda i: (0, 0)),
            pl.BlockSpec((1, n_pad), lambda i: (0, 0)),
        ],
        out_specs=pl.BlockSpec((tile_b, n_pad), lambda i: (i, 0)),
        compiler_params=pltpu.CompilerParams(
            dimension_semantics=("parallel",),       # shard batch tiles across TCs (v7x)
            vmem_limit_bytes=32 * 1024 * 1024,       # explicit headroom, safe on v5e/v6e/v7x
        ),
    )(xp, w1p, b1, w2p, b2p)

    # Slice away batch / action padding.
    return out[:B, :action_n]


def init_params(key, state_n, action_n, hidden=256):
    """Deterministic init matching PyTorch nn.Linear's default
    U(-1/sqrt(fan_in), 1/sqrt(fan_in)) scheme (shapes only; synthetic weights)."""
    k1, k2, k3, k4 = jax.random.split(key, 4)
    bound1 = 1.0 / math.sqrt(state_n)
    bound2 = 1.0 / math.sqrt(hidden)
    w1 = jax.random.uniform(k1, (state_n, hidden), jnp.float32, -bound1, bound1)
    b1 = jax.random.uniform(k2, (1, hidden), jnp.float32, -bound1, bound1)
    w2 = jax.random.uniform(k3, (hidden, action_n), jnp.float32, -bound2, bound2)
    b2 = jax.random.uniform(k4, (1, action_n), jnp.float32, -bound2, bound2)
    return w1, b1, w2, b2


def reference_forward(x, w1, b1, w2, b2):
    h = jnp.maximum(x @ w1 + b1, 0.0)
    return h @ w2 + b2


if __name__ == "__main__":
    key = jax.random.PRNGKey(0)
    k_x, k_p = jax.random.split(key)

    batch = 2
    state_n = 8       # small "state" dimension
    action_n = 4      # small "action" dimension

    x = jax.random.normal(k_x, (batch, state_n), jnp.float32)
    w1, b1, w2, b2 = init_params(k_p, state_n, action_n)

    # Jit the wrapper so padding + kernel fuse into one step.
    fwd = jax.jit(network_forward)

    out = fwd(x, w1, b1, w2, b2)
    out = jax.block_until_ready(out)

    ref = reference_forward(x, w1, b1, w2, b2)
    assert out.shape == (batch, action_n)
    assert jnp.allclose(out, ref, atol=1e-5, rtol=1e-5), "mismatch vs reference"

    # Also exercise a larger, multi-tile batch to validate the grid path
    # (not a multiple of the batch tile -> exercises batch padding).
    big_b = 1040
    xb = jax.random.normal(k_x, (big_b, state_n), jnp.float32)
    out_b = jax.block_until_ready(fwd(xb, w1, b1, w2, b2))
    ref_b = reference_forward(xb, w1, b1, w2, b2)
    assert out_b.shape == (big_b, action_n)
    assert jnp.allclose(out_b, ref_b, atol=1e-4, rtol=1e-4), "mismatch vs reference (big batch)"

    print("KERNEL_OK")
</pallas_src>

<mosaic_0001>
module attributes {stable_mosaic.version = 11 : i64} {
  func.func @_mlp_kernel(%arg0: i32, %arg1: memref<8x128xf32, #tpu.memory_space<vmem>>, %arg2: memref<128x256xf32, #tpu.memory_space<vmem>>, %arg3: memref<1x256xf32, #tpu.memory_space<vmem>>, %arg4: memref<256x128xf32, #tpu.memory_space<vmem>>, %arg5: memref<1x128xf32, #tpu.memory_space<vmem>>, %arg6: memref<8x128xf32, #tpu.memory_space<vmem>>) attributes {dimension_semantics = [#tpu.dimension_semantics<parallel>], iteration_bounds = array<i64: 1>, scalar_prefetch = 0 : i64, scratch_operands = 0 : i64, tpu.core_type = #tpu.core_type<tc>, window_params = [{transform_indices = @transform_0, window_bounds = array<i64: 8, 128>}, {pipeline_mode = #tpu.pipeline_mode<synchronous>, transform_indices = @transform_1, window_bounds = array<i64: 128, 256>}, {pipeline_mode = #tpu.pipeline_mode<synchronous>, transform_indices = @transform_2, window_bounds = array<i64: 1, 256>}, {pipeline_mode = #tpu.pipeline_mode<synchronous>, transform_indices = @transform_3, window_bounds = array<i64: 256, 128>}, {pipeline_mode = #tpu.pipeline_mode<synchronous>, transform_indices = @transform_4, window_bounds = array<i64: 1, 128>}, {transform_indices = @transform_5, window_bounds = array<i64: 8, 128>}]} {
    %c0 = arith.constant 0 : index
    %c0_0 = arith.constant 0 : index
    %0 = vector.load %arg1[%c0, %c0_0] : memref<8x128xf32, #tpu.memory_space<vmem>>, vector<8x128xf32>
    %c0_1 = arith.constant 0 : index
    %c0_2 = arith.constant 0 : index
    %1 = vector.load %arg2[%c0_1, %c0_2] : memref<128x256xf32, #tpu.memory_space<vmem>>, vector<128x256xf32>
    %cst = arith.constant dense<0.000000e+00> : vector<8x256xf32>
    %2 = tpu.matmul %0, %1, %cst {dimension_numbers = #tpu.dot_dimension_numbers<[1], [0], [0], [1], [0, 0, 1, 1], [], []>} : vector<8x128xf32>, vector<128x256xf32>, vector<8x256xf32> -> vector<8x256xf32>
    %c0_3 = arith.constant 0 : index
    %c0_4 = arith.constant 0 : index
    %3 = vector.load %arg3[%c0_3, %c0_4] : memref<1x256xf32, #tpu.memory_space<vmem>>, vector<1x256xf32>
    %4 = vector.broadcast %3 : vector<1x256xf32> to vector<8x256xf32>
    %5 = arith.addf %2, %4 : vector<8x256xf32>
    %cst_5 = arith.constant 0.000000e+00 : f32
    %6 = vector.broadcast %cst_5 : f32 to vector<8x256xf32>
    %7 = arith.maximumf %5, %6 : vector<8x256xf32>
    %c0_6 = arith.constant 0 : index
    %c0_7 = arith.constant 0 : index
    %8 = vector.load %arg4[%c0_6, %c0_7] : memref<256x128xf32, #tpu.memory_space<vmem>>, vector<256x128xf32>
    %cst_8 = arith.constant dense<0.000000e+00> : vector<8x128xf32>
    %9 = tpu.matmul %7, %8, %cst_8 {dimension_numbers = #tpu.dot_dimension_numbers<[1], [0], [0], [1], [0, 0, 1, 1], [], []>} : vector<8x256xf32>, vector<256x128xf32>, vector<8x128xf32> -> vector<8x128xf32>
    %c0_9 = arith.constant 0 : index
    %c0_10 = arith.constant 0 : index
    %10 = vector.load %arg5[%c0_9, %c0_10] : memref<1x128xf32, #tpu.memory_space<vmem>>, vector<1x128xf32>
    %11 = vector.broadcast %10 : vector<1x128xf32> to vector<8x128xf32>
    %12 = arith.addf %9, %11 : vector<8x128xf32>
    %c0_11 = arith.constant 0 : index
    %c0_12 = arith.constant 0 : index
    %13 = vector.load %arg6[%c0_11, %c0_12] : memref<8x128xf32, #tpu.memory_space<vmem>>, vector<8x128xf32>
    tpu.vector_store %arg6[%c0_11, %c0_12], %12 {strides = array<i32>} : memref<8x128xf32, #tpu.memory_space<vmem>>, vector<8x128xf32>,
    return
  }
  func.func @transform_0(%arg0: i32) -> (i32, i32) {
    %c0_i32 = arith.constant 0 : i32
    %c0_i32_0 = arith.constant 0 : i32
    return %arg0, %c0_i32 : i32, i32
  }
  func.func @transform_1(%arg0: i32) -> (i32, i32) {
    %c0_i32 = arith.constant 0 : i32
    %c0_i32_0 = arith.constant 0 : i32
    %c0_i32_1 = arith.constant 0 : i32
    return %c0_i32, %c0_i32_0 : i32, i32
  }
  func.func @transform_2(%arg0: i32) -> (i32, i32) {
    %c0_i32 = arith.constant 0 : i32
    %c0_i32_0 = arith.constant 0 : i32
    %c0_i32_1 = arith.constant 0 : i32
    return %c0_i32, %c0_i32_0 : i32, i32
  }
  func.func @transform_3(%arg0: i32) -> (i32, i32) {
    %c0_i32 = arith.constant 0 : i32
    %c0_i32_0 = arith.constant 0 : i32
    %c0_i32_1 = arith.constant 0 : i32
    return %c0_i32, %c0_i32_0 : i32, i32
  }
  func.func @transform_4(%arg0: i32) -> (i32, i32) {
    %c0_i32 = arith.constant 0 : i32
    %c0_i32_0 = arith.constant 0 : i32
    %c0_i32_1 = arith.constant 0 : i32
    return %c0_i32, %c0_i32_0 : i32, i32
  }
  func.func @transform_5(%arg0: i32) -> (i32, i32) {
    %c0_i32 = arith.constant 0 : i32
    %c0_i32_0 = arith.constant 0 : i32
    return %arg0, %c0_i32 : i32, i32
  }
}

</mosaic_0001>

<bundles_post_ra>
// kernel: network_forward.1
= control target key start
LH: loop header
LB: loop body
LE: loop exit
PB: predicated region body
PF: predicated region fallthrough
CT: control target
= control target key end

     0   :  { %v353_v3 = vmov 0.0   ;;  %s588_s1 = inlined_call_operand.vmem [shape: f32[128,256], index: 1, kind: input, shape index: {}]   ;;  %s589_s3 = inlined_call_operand.vmem [shape: f32[256,128], index: 3, kind: input, shape index: {}]   ;;  %s590_s0 = inlined_call_operand.vmem [shape: f32[8,128], index: 0, kind: input, shape index: {}]   ;;  %s591_s2 = inlined_call_operand.vmem [shape: f32[1,256], index: 2, kind: input, shape index: {}]   ;;  %s592_s4 = inlined_call_operand.vmem [shape: f32[1,128], index: 4, kind: input, shape index: {}]   ;;  %s593_s5 = inlined_call_operand.vmem [shape: f32[8,128], index: 5, kind: output, shape index: {}]  }
   0x1   :  { %v22_v0 = vld [vmem:[%s588_s1 + $0x8] sm:$0xff]  ;;  %v24_v1 = vld [vmem:[%s588_s1 + $0x18] sm:$0xff]  ;;  %v21_v2 = vld [vmem:[%s588_s1] sm:$0xff]  ;;  %129 = vmatprep.mubr.f32.mxu0 %v353_v3 }
   0x2   :  { %v288_v4 = vpack.c.bf16 %v24_v1, %v22_v0  ;;  %v23_v5 = vld [vmem:[%s588_s1 + $0x10] sm:$0xff]  ;;  %v26_v6 = vld [vmem:[%s588_s1 + $0x28] sm:$0xff]  ;;  %v28_v7 = vld [vmem:[%s588_s1 + $0x38] sm:$0xff] }
   0x3   :  { %v290_v8 = vpack.c.bf16 %v23_v5, %v21_v2  ;;  %v292_v9 = vpack.c.bf16 %v28_v7, %v26_v6  ;;  %v25_v10 = vld [vmem:[%s588_s1 + $0x20] sm:$0xff]  ;;  %v27_v11 = vld [vmem:[%s588_s1 + $0x30] sm:$0xff]  ;;  %v30_v12 = vld [vmem:[%s588_s1 + $0x48] sm:$0xff] }
   0x4   :  { %289 = vmatprep.subr.bf16.mxu0 %v288_v4  ;;  %v32_v13 = vld [vmem:[%s588_s1 + $0x58] sm:$0xff]  ;;  %v294_v14 = vpack.c.bf16 %v27_v11, %v25_v10  ;;  %v29_v16 = vld [vmem:[%s588_s1 + $0x40] sm:$0xff]  ;;  %v31_v17 = vld [vmem:[%s588_s1 + $0x50] sm:$0xff] }
   0x5   :  { %291 = vmatpush1.bf16.msra.mxu0 %v290_v8  ;;  %v296_v15 = vpack.c.bf16 %v32_v13, %v30_v12  ;;  %v34_v18 = vld [vmem:[%s588_s1 + $0x68] sm:$0xff]  ;;  %v36_v19 = vld [vmem:[%s588_s1 + $0x78] sm:$0xff]  ;;  %v298_v20 = vpack.c.bf16 %v31_v17, %v29_v16  ;;  %v33_v22 = vld [vmem:[%s588_s1 + $0x60] sm:$0xff] }
   0x6   :  { %293 = vmatprep.subr.bf16.mxu0 %v292_v9  ;;  %v300_v21 = vpack.c.bf16 %v36_v19, %v34_v18  ;;  %v35_v23 = vld [vmem:[%s588_s1 + $0x70] sm:$0xff]  ;;  %v38_v24 = vld [vmem:[%s588_s1 + $0x88] sm:$0xff]  ;;  %v40_v25 = vld [vmem:[%s588_s1 + $0x98] sm:$0xff] }
   0x7   :  { %v37_v26 = vld [vmem:[%s588_s1 + $0x80] sm:$0xff]  ;;  %v39_v27 = vld [vmem:[%s588_s1 + $0x90] sm:$0xff]  ;;  %v155_v29 = vld [vmem:[%s589_s3 + $0x88] sm:$0xff]  ;;  %v302_v31 = vpack.c.bf16 %v35_v23, %v33_v22  ;;  %v304_v36 = vpack.c.bf16 %v40_v25, %v38_v24 }
   0x8   :  { %v154_v28 = vld [vmem:[%s589_s3 + $0x80] sm:$0xff]  ;;  %v139_v33 = vld [vmem:[%s589_s3 + $0x8] sm:$0xff]  ;;  %v156_v34 = vld [vmem:[%s589_s3 + $0x90] sm:$0xff]  ;;  %v306_v46 = vpack.c.bf16 %v39_v27, %v37_v26 }
   0x9   :  { %295 = vmatpush1.bf16.msra.mxu0 %v294_v14  ;;  %v138_v30 = vld [vmem:[%s589_s3] sm:$0xff]  ;;  %v320_v32 = vpack.c.bf16 %v155_v29, %v154_v28  ;;  %v157_v35 = vld [vmem:[%s589_s3 + $0x98] sm:$0xff]  ;;  %v140_v39 = vld [vmem:[%s589_s3 + $0x10] sm:$0xff] }
   0xa   :  { %297 = vmatprep.subr.bf16.mxu0 %v296_v15  ;;  %v322_v37 = vpack.c.bf16 %v139_v33, %v138_v30  ;;  %v324_v38 = vpack.c.bf16 %v157_v35, %v156_v34  ;;  %v141_v40 = vld [vmem:[%s589_s3 + $0x18] sm:$0xff]  ;;  %v158_v41 = vld [vmem:[%s589_s3 + $0xa0] sm:$0xff]  ;;  %v42_v42 = vld [vmem:[%s588_s1 + $0xa8] sm:$0xff]  ;;  %v55_v34 = vlaneseq }
   0xb   :  { %v44_v43 = vld [vmem:[%s588_s1 + $0xb8] sm:$0xff]  ;;  %321 = vmatprep.subr.bf16.mxu1 %v320_v32  ;;  %v159_v44 = vld [vmem:[%s589_s3 + $0xa8] sm:$0xff]  ;;  %v326_v45 = vpack.c.bf16 %v141_v40, %v140_v39  ;;  %v41_v47 = vld [vmem:[%s588_s1 + $0xa0] sm:$0xff] }
   0xc   :  { %323 = vmatpush3.bf16.msra.mxu1 %v322_v37  ;;  %v328_v48 = vpack.c.bf16 %v159_v44, %v158_v41  ;;  %v142_v49 = vld [vmem:[%s589_s3 + $0x20] sm:$0xff]  ;;  %v143_v50 = vld [vmem:[%s589_s3 + $0x28] sm:$0xff]  ;;  %v308_v51 = vpack.c.bf16 %v44_v43, %v42_v42  ;;  %v43_v52 = vld [vmem:[%s588_s1 + $0xb0] sm:$0xff]  ;;  %v56_v35 = vshrl.u32 %v55_v34, 7 }
   0xd   :  { %299 = vmatpush1.bf16.msra.mxu0 %v298_v20  ;;  %325 = vmatprep.subr.bf16.mxu1 %v324_v38  ;;  %v160_v53 = vld [vmem:[%s589_s3 + $0xb0] sm:$0xff]  ;;  %v161_v54 = vld [vmem:[%s589_s3 + $0xb8] sm:$0xff]  ;;  %v46_v55 = vld [vmem:[%s588_s1 + $0xc8] sm:$0xff]  ;;  %v330_v57 = vpack.c.bf16 %v143_v50, %v142_v49  ;;  %v310_v58 = vpack.c.bf16 %v43_v52, %v41_v47 }
   0xe   :  { %301 = vmatprep.subr.bf16.mxu0 %v300_v21  ;;  %v48_v56 = vld [vmem:[%s588_s1 + $0xd8] sm:$0xff]  ;;  %v45_v59 = vld [vmem:[%s588_s1 + $0xc0] sm:$0xff]  ;;  %v332_v60 = vpack.c.bf16 %v161_v54, %v160_v53  ;;  %v144_v61 = vld [vmem:[%s589_s3 + $0x30] sm:$0xff]  ;;  %v61_v38 = vsub.s32 1, %v56_v35 }
   0xf   :  { %v145_v62 = vld [vmem:[%s589_s3 + $0x38] sm:$0xff]  ;;  %v312_v63 = vpack.c.bf16 %v48_v56, %v46_v55  ;;  %v47_v0 = vld [vmem:[%s588_s1 + $0xd0] sm:$0xff]  ;;  %v162_v1 = vld [vmem:[%s589_s3 + $0xc0] sm:$0xff] }
  0x10   :  { %327 = vmatpush3.bf16.msra.mxu1 %v326_v45  ;;  %v163_v2 = vld [vmem:[%s589_s3 + $0xc8] sm:$0xff]  ;;  %v52_v4 = vld [vmem:[%s588_s1 + $0xf8] sm:$0xff]  ;;  %v334_v5 = vpack.c.bf16 %v145_v62, %v144_v61  ;;  %v314_v6 = vpack.c.bf16 %v47_v0, %v45_v59  ;;  %v49_v7 = vld [vmem:[%s588_s1 + $0xe0] sm:$0xff] }
  0x11   :  { %303 = vmatpush1.bf16.msra.mxu0 %v302_v31  ;;  %329 = vmatprep.subr.bf16.mxu1 %v328_v48  ;;  %v50_v3 = vld [vmem:[%s588_s1 + $0xe8] sm:$0xff]  ;;  %v336_v8 = vpack.c.bf16 %v163_v2, %v162_v1  ;;  %v146_v9 = vld [vmem:[%s589_s3 + $0x40] sm:$0xff]  ;;  %v51_v12 = vld [vmem:[%s588_s1 + $0xf0] sm:$0xff] }
  0x12   :  { %305 = vmatprep.subr.bf16.mxu0 %v304_v36  ;;  %v147_v10 = vld [vmem:[%s589_s3 + $0x48] sm:$0xff]  ;;  %v316_v11 = vpack.c.bf16 %v52_v4, %v50_v3  ;;  %v164_v13 = vld [vmem:[%s589_s3 + $0xd0] sm:$0xff]  ;;  %v165_v14 = vld [vmem:[%s589_s3 + $0xd8] sm:$0xff]  ;;  %v318_v16 = vpack.c.bf16 %v51_v12, %v49_v7  ;;  %v57_v36 = vsub.s32 0, %v56_v35 }
  0x13   :  { %v338_v15 = vpack.c.bf16 %v147_v10, %v146_v9  ;;  %v340_v17 = vpack.c.bf16 %v165_v14, %v164_v13  ;;  %v148_v18 = vld [vmem:[%s589_s3 + $0x50] sm:$0xff]  ;;  %v149_v19 = vld [vmem:[%s589_s3 + $0x58] sm:$0xff]  ;;  %v166_v20 = vld [vmem:[%s589_s3 + $0xe0] sm:$0xff] }
  0x14   :  { %331 = vmatpush3.bf16.msra.mxu1 %v330_v57  ;;  %v167_v21 = vld [vmem:[%s589_s3 + $0xe8] sm:$0xff]  ;;  %v342_v22 = vpack.c.bf16 %v149_v19, %v148_v18  ;;  %v20_v23 = vld [vmem:[%s590_s0] sm:$0xff]  ;;  %v168_v28 = vld [vmem:[%s589_s3 + $0xf0] sm:$0xff] }
  0x15   :  { %307 = vmatpush1.bf16.msra.mxu0 %v306_v46  ;;  %333 = vmatprep.subr.bf16.mxu1 %v332_v60  ;;  %v344_v24 = vpack.c.bf16 %v167_v21, %v166_v20  ;;  %v150_v25 = vld [vmem:[%s589_s3 + $0x60] sm:$0xff]  ;;  %v151_v26 = vld [vmem:[%s589_s3 + $0x68] sm:$0xff]  ;;  %v169_v29 = vld [vmem:[%s589_s3 + $0xf8] sm:$0xff] }
  0x16   :  { %309 = vmatprep.subr.bf16.mxu0 %v308_v51  ;;  %v346_v27 = vpack.c.bf16 %v151_v26, %v150_v25  ;;  %v348_v30 = vpack.c.bf16 %v169_v29, %v168_v28  ;;  %v152_v31 = vld [vmem:[%s589_s3 + $0x70] sm:$0xff]  ;;  %v153_v32 = vld [vmem:[%s589_s3 + $0x78] sm:$0xff]  ;;  %v53_v37 = vld [vmem:[%s591_s2] sm:$0x3] }
  0x17   :  { %v350_v33 = vpack.c.bf16 %v153_v32, %v152_v31  ;;  %v58_v39 = vrot.slane %v53_v37, %v57_v36  ;;  %v62_v40 = vrot.slane %v53_v37, %v61_v38  ;;  %v252_v48 = vld [vmem:[%s592_s4] ss:$0 sm:$0xff] }
  0x18   :  { %335 = vmatpush3.bf16.msra.mxu1 %v334_v5 }
  0x19   :  { %311 = vmatpush1.bf16.msra.mxu0 %v310_v58  ;;  %337 = vmatprep.subr.bf16.mxu1 %v336_v8 }
  0x1a   :  { %313 = vmatprep.subr.bf16.mxu0 %v312_v63 }
  0x1c   :  { %339 = vmatpush3.bf16.msra.mxu1 %v338_v15 }
  0x1d   :  { %315 = vmatpush1.bf16.msra.mxu0 %v314_v6  ;;  %341 = vmatprep.subr.bf16.mxu1 %v340_v17 }
  0x1e   :  { %317 = vmatprep.subr.bf16.mxu0 %v316_v11 }
  0x20   :  { %343 = vmatpush3.bf16.msra.mxu1 %v342_v22 }
  0x21   :  { %319 = vmatpush1.bf16.msra.mxu0 %v318_v16  ;;  %345 = vmatprep.subr.bf16.mxu1 %v344_v24 }
  0x24   :  { %130 = vmatmul.mubr.f32.vlgmr.msra.gmra.mrb[0].mxu0 %v20_v23  ;;  %347 = vmatpush3.bf16.msra.mxu1 %v346_v27 }
  0x25   :  { %349 = vmatprep.subr.bf16.mxu1 %v348_v30 }
  0x28   :  { %351 = vmatpush3.bf16.msra.mxu1 %v350_v33 }
  0xf7   :  { %v131_v41 = vpop.f32.mrb[0].mxu0 }
  0xf8   :  { %v132_v42 = vadd.f32 %v131_v41, %v58_v39  ;;  %v133_v43 = vpop.f32.mrb[1].mxu0 }
  0xf9   :  { %v134_v44 = vadd.f32 %v133_v43, %v62_v40 }
  0xfa   :  { %v136_v46 = vmax.f32 %v132_v42, 0.0 }
  0xfb   :  { %v137_v45 = vmax.f32 %v134_v44, 0.0 }
  0xfd   :  { %241 = vmatprep.mubr.f32.mxu1 %v137_v45 }
  0xfe   :  { %242 = vmatmul.mubr.f32.vlgmr.msra.gmra.mrb[0].mxu1 %v136_v46 }
 0x1d1   :  { %v285_v47 = vpop.f32.mrb[0].mxu1 }
 0x1d2   :  { %v286_v49 = vpop.f32.mrb[1].mxu1 }
 0x1d3   :  { %v287_v50 = vadd.f32 %v286_v49, %v285_v47 }
 0x1d5   :  { %v244_v51 = vadd.f32 %v287_v50, %v252_v48 }
 0x1d7   :  { %247 = vst [vmem:[%s593_s5] sm:$0xff] %v244_v51 }

</bundles_post_ra>
